<compile_context>
chip_gen: v5e
topology: v5e:2x2
jax: 0.10.0
libtpu: 0.0.40
codegen_flags: <defaults>
</compile_context>

<pallas_src>
import functools
import math

import jax
import jax.numpy as jnp
from jax.experimental import pallas as pl
from jax.experimental.pallas import tpu as pltpu


def _vmem_limit_bytes():
    """Per-generation scoped-VMEM limit (review: ~48 MiB on v7x, 96 MiB on v5e/v6e)."""
    try:
        cap = int(pltpu.get_tpu_info().vmem_capacity_bytes)
    except Exception:
        return None                      # unknown -> keep compiler default
    if cap <= 64 * 1024 * 1024:          # v7x-class: 64 MiB physical per TC
        return 48 * 1024 * 1024
    return 96 * 1024 * 1024              # v5e / v6e: 128 MiB physical


def _pick_tile(seq_len, pref):
    """Largest tile <= pref that divides seq_len (multiples of 8 preferred)."""
    for t in (pref, 512, 256, 128, 64, 32, 16, 8):
        if t <= seq_len and seq_len % t == 0:
            return t
    return seq_len


# ---------------------------------------------------------------------------
# Fused kernel: QKV projection + flash (online-softmax) attention + output
# projection.  Grid = (B, num_q_tiles, num_kv_tiles); KV axis is a reduction.
# ---------------------------------------------------------------------------
def _mha_kernel(xq_ref, xkv_ref, wq_ref, bq_ref, wkv_ref, bkv_ref,
                wo_ref, bo_ref, out_ref,
                q_scr, m_scr, l_scr, acc_scr, *,
                n_heads, d_head, compute_dtype):
    H, Dh = n_heads, d_head
    HD = H * Dh
    ki = pl.program_id(2)
    nk = pl.num_programs(2)

    @pl.when(ki == 0)
    def _init():
        # Q projection for this q-tile (1/sqrt(Dh) already folded into wq/bq).
        x_q = xq_ref[0]                                              # (TQ, dm)
        q = jnp.dot(x_q, wq_ref[...],
                    preferred_element_type=jnp.float32) + bq_ref[...]
        q_scr[...] = q.astype(compute_dtype)
        m_scr[...] = jnp.full_like(m_scr, -jnp.inf)
        l_scr[...] = jnp.zeros_like(l_scr)
        acc_scr[...] = jnp.zeros_like(acc_scr)

    # K/V projection for this kv-tile (all heads in one matmul); cast to the
    # compute dtype immediately so only one (TK, 2*HD) slab is live.
    x_kv = xkv_ref[0]                                                # (TK, dm)
    kv = (jnp.dot(x_kv, wkv_ref[...], preferred_element_type=jnp.float32)
          + bkv_ref[...]).astype(compute_dtype)                      # (TK, 2*HD)

    q = q_scr[...]                                                   # (TQ, HD)

    # TODO(synk): at production head dims (Dh >= 64, HD >= 512) batch the heads
    #             in a single 3-D dot_general (or pad Dh); the static per-head
    #             loop below is fine for small H but uses narrow MXU passes.
    for h in range(H):                                 # static unroll, H small
        lo, hi = h * Dh, (h + 1) * Dh
        k_h = kv[:, lo:hi]                                           # (TK, Dh)
        v_h = kv[:, HD + lo:HD + hi]                                 # (TK, Dh)

        # scores (TQ, TK): contract over Dh, no explicit K transpose.
        s_h = jax.lax.dot_general(
            q[:, lo:hi], k_h,
            dimension_numbers=(((1,), (1,)), ((), ())),
            preferred_element_type=jnp.float32)

        m_prev = m_scr[:, h:h + 1]                                   # (TQ, 1)
        l_prev = l_scr[:, h:h + 1]
        m_new = jnp.maximum(m_prev, jnp.max(s_h, axis=-1, keepdims=True))
        alpha = jnp.exp(m_prev - m_new)
        p = jnp.exp(s_h - m_new)                                     # (TQ, TK)
        # TODO(synk): training-mode nn.Dropout(p=0.1) on the attention weights
        #             and the attn_mask masked_fill path are omitted
        #             (eval mode / attn_mask=None).
        l_scr[:, h:h + 1] = alpha * l_prev + jnp.sum(p, axis=-1, keepdims=True)
        m_scr[:, h:h + 1] = m_new
        acc_scr[:, lo:hi] = alpha * acc_scr[:, lo:hi] + jnp.dot(
            p.astype(compute_dtype), v_h, preferred_element_type=jnp.float32)

    @pl.when(ki == nk - 1)
    def _finalize():
        # Normalize per head in place, then fused output projection — the
        # context never leaves VMEM.
        for h in range(H):
            lo, hi = h * Dh, (h + 1) * Dh
            inv = pl.reciprocal(l_scr[:, h:h + 1], approx=True)
            acc_scr[:, lo:hi] = acc_scr[:, lo:hi] * inv
        ctx = acc_scr[...].astype(compute_dtype)                     # (TQ, HD)
        out = (jnp.dot(ctx, wo_ref[...], preferred_element_type=jnp.float32)
               + bo_ref[...])
        out_ref[0] = out.astype(out_ref.dtype)


# ---------------------------------------------------------------------------
# One-time parameter preprocessing (done once, not per call):
#   * reorder PyTorch qkv_proj weight columns to [Q heads | K heads | V heads]
#   * fold 1/sqrt(d_head) into the Q weight and bias
#   * pre-transpose out_proj weight
# ---------------------------------------------------------------------------
def prepare_params(params, n_heads, d_head, *, compute_dtype=jnp.float32):
    H, Dh = n_heads, d_head
    HD = H * Dh
    qkv_w = params["qkv_w"]                   # (3*H*Dh, d_model), torch layout
    qkv_b = params["qkv_b"]                   # (3*H*Dh,)
    d_model = qkv_w.shape[1]

    w_r = qkv_w.reshape(H, 3, Dh, d_model)    # (head, qkv, dh, d_model)
    b_r = qkv_b.reshape(H, 3, Dh)
    w_qkv = jnp.transpose(w_r, (3, 1, 0, 2)).reshape(d_model, 3 * HD)
    b_qkv = jnp.transpose(b_r, (1, 0, 2)).reshape(3 * HD)

    scale = 1.0 / math.sqrt(Dh)
    return {
        "w_q": (w_qkv[:, :HD] * scale).astype(compute_dtype),        # (dm, HD)
        "b_q": (b_qkv[:HD] * scale).reshape(1, HD).astype(jnp.float32),
        "w_kv": w_qkv[:, HD:].astype(compute_dtype),                 # (dm, 2HD)
        "b_kv": b_qkv[HD:].reshape(1, 2 * HD).astype(jnp.float32),
        "w_o": params["out_w"].T.astype(compute_dtype),              # (HD, dm)
        "b_o": params["out_b"].reshape(1, d_model).astype(jnp.float32),
    }


def multi_head_attention(x, prep, n_heads, d_head, *,
                         compute_dtype=jnp.float32, out_dtype=None,
                         q_tile=256, kv_tile=256):
    B, S, d_model = x.shape
    H, Dh = n_heads, d_head
    HD = H * Dh
    out_dtype = x.dtype if out_dtype is None else out_dtype

    TQ = _pick_tile(S, q_tile)
    TK = _pick_tile(S, kv_tile)
    NQ = S // TQ
    NK = S // TK

    x_c = x.astype(compute_dtype)
    kernel = functools.partial(_mha_kernel, n_heads=H, d_head=Dh,
                               compute_dtype=compute_dtype)

    out = pl.pallas_call(
        kernel,
        out_shape=jax.ShapeDtypeStruct((B, S, d_model), out_dtype),
        grid=(B, NQ, NK),
        in_specs=[
            pl.BlockSpec((1, TQ, d_model), lambda b, qi, ki: (b, qi, 0)),  # x q-tile
            pl.BlockSpec((1, TK, d_model), lambda b, qi, ki: (b, ki, 0)),  # x kv-tile
            pl.BlockSpec((d_model, HD), lambda b, qi, ki: (0, 0)),         # w_q (resident)
            pl.BlockSpec((1, HD), lambda b, qi, ki: (0, 0)),               # b_q
            pl.BlockSpec((d_model, 2 * HD), lambda b, qi, ki: (0, 0)),     # w_kv (resident)
            pl.BlockSpec((1, 2 * HD), lambda b, qi, ki: (0, 0)),           # b_kv
            pl.BlockSpec((HD, d_model), lambda b, qi, ki: (0, 0)),         # w_o (resident)
            pl.BlockSpec((1, d_model), lambda b, qi, ki: (0, 0)),          # b_o
        ],
        out_specs=pl.BlockSpec((1, TQ, d_model), lambda b, qi, ki: (b, qi, 0)),
        scratch_shapes=[
            pltpu.VMEM((TQ, HD), compute_dtype),   # Q for the current q-tile
            pltpu.VMEM((TQ, H), jnp.float32),      # running max per head
            pltpu.VMEM((TQ, H), jnp.float32),      # running denom per head
            pltpu.VMEM((TQ, HD), jnp.float32),     # unnormalized context acc
        ],
        compiler_params=pltpu.CompilerParams(
            dimension_semantics=("parallel", "parallel", "arbitrary"),
            vmem_limit_bytes=_vmem_limit_bytes()),
    )(x_c, x_c, prep["w_q"], prep["b_q"], prep["w_kv"], prep["b_kv"],
      prep["w_o"], prep["b_o"])

    return out


# ---------------------------------------------------------------------------
# Pure-JAX reference (mirrors the PyTorch forward exactly) for verification.
# ---------------------------------------------------------------------------
def reference_mha(x, params, n_heads, d_head):
    B, S, _ = x.shape
    H, Dh = n_heads, d_head
    qkv = x @ params["qkv_w"].T + params["qkv_b"]              # (B,S,3*H*Dh)
    qkv = qkv.reshape(B, S, H, 3 * Dh).transpose(2, 0, 1, 3)   # (H,B,S,3*Dh)
    q, k, v = jnp.split(qkv, 3, axis=-1)                       # (H,B,S,Dh)
    scores = jnp.einsum("hbqd,hbkd->hbqk", q, k) / math.sqrt(Dh)
    w = jax.nn.softmax(scores, axis=-1)
    ctx = jnp.einsum("hbqk,hbkd->hbqd", w, v)
    ctx = ctx.transpose(1, 2, 0, 3).reshape(B, S, H * Dh)
    return ctx @ params["out_w"].T + params["out_b"]


def init_params(key, n_heads, d_model, d_head):
    H, Dh = n_heads, d_head
    k1, k2, k3, k4 = jax.random.split(key, 4)
    lim_qkv = 1.0 / math.sqrt(d_model)
    lim_out = 1.0 / math.sqrt(H * Dh)
    return {
        "qkv_w": jax.random.uniform(k1, (3 * H * Dh, d_model), jnp.float32,
                                    -lim_qkv, lim_qkv),
        "qkv_b": jax.random.uniform(k2, (3 * H * Dh,), jnp.float32,
                                    -lim_qkv, lim_qkv),
        "out_w": jax.random.uniform(k3, (d_model, H * Dh), jnp.float32,
                                    -lim_out, lim_out),
        "out_b": jax.random.uniform(k4, (d_model,), jnp.float32,
                                    -lim_out, lim_out),
    }


if __name__ == "__main__":
    B, S, D_MODEL = 2, 8, 32
    N_HEADS, D_HEAD = 4, 8

    key = jax.random.PRNGKey(0)
    kx, kp = jax.random.split(key)
    x = jax.random.normal(kx, (B, S, D_MODEL), dtype=jnp.float32)
    params = init_params(kp, N_HEADS, D_MODEL, D_HEAD)

    ref = reference_mha(x, params, N_HEADS, D_HEAD)

    # faithful f32 path (approx reciprocal only in the softmax normalization)
    prep_f32 = prepare_params(params, N_HEADS, D_HEAD, compute_dtype=jnp.float32)
    out = multi_head_attention(x, prep_f32, N_HEADS, D_HEAD,
                               compute_dtype=jnp.float32)
    out = jax.block_until_ready(out)
    assert out.shape == (B, S, D_MODEL)
    err_f32 = float(jnp.max(jnp.abs(out - ref)))
    assert err_f32 < 5e-3, f"f32 mismatch vs reference: {err_f32}"

    # bf16-at-MXU throughput path: f32 accumulation / f32 softmax stats,
    # bf16 activation writeback.
    prep_bf16 = prepare_params(params, N_HEADS, D_HEAD, compute_dtype=jnp.bfloat16)
    out_bf16 = multi_head_attention(x, prep_bf16, N_HEADS, D_HEAD,
                                    compute_dtype=jnp.bfloat16,
                                    out_dtype=jnp.bfloat16)
    out_bf16 = jax.block_until_ready(out_bf16)
    err_bf16 = float(jnp.max(jnp.abs(out_bf16.astype(jnp.float32) - ref)))
    assert err_bf16 < 2e-1, f"bf16 mismatch vs reference: {err_bf16}"

    print("KERNEL_OK")
</pallas_src>

<mosaic_0001>
module attributes {stable_mosaic.version = 11 : i64} {
  func.func @_mha_kernel(%arg0: i32, %arg1: i32, %arg2: i32, %arg3: memref<1x8x32xf32, #tpu.memory_space<vmem>>, %arg4: memref<1x8x32xf32, #tpu.memory_space<vmem>>, %arg5: memref<32x32xf32, #tpu.memory_space<vmem>>, %arg6: memref<1x32xf32, #tpu.memory_space<vmem>>, %arg7: memref<32x64xf32, #tpu.memory_space<vmem>>, %arg8: memref<1x64xf32, #tpu.memory_space<vmem>>, %arg9: memref<32x32xf32, #tpu.memory_space<vmem>>, %arg10: memref<1x32xf32, #tpu.memory_space<vmem>>, %arg11: memref<1x8x32xf32, #tpu.memory_space<vmem>>, %arg12: memref<8x32xf32, #tpu.memory_space<vmem>>, %arg13: memref<8x4xf32, #tpu.memory_space<vmem>>, %arg14: memref<8x4xf32, #tpu.memory_space<vmem>>, %arg15: memref<8x32xf32, #tpu.memory_space<vmem>>) attributes {dimension_semantics = [#tpu.dimension_semantics<parallel>, #tpu.dimension_semantics<parallel>, #tpu.dimension_semantics<arbitrary>], iteration_bounds = array<i64: 2, 1, 1>, scalar_prefetch = 0 : i64, scratch_operands = 4 : i64, tpu.core_type = #tpu.core_type<tc>, window_params = [{transform_indices = @transform_0, window_bounds = array<i64: 1, 8, 32>}, {transform_indices = @transform_1, window_bounds = array<i64: 1, 8, 32>}, {pipeline_mode = #tpu.pipeline_mode<synchronous>, transform_indices = @transform_2, window_bounds = array<i64: 32, 32>}, {pipeline_mode = #tpu.pipeline_mode<synchronous>, transform_indices = @transform_3, window_bounds = array<i64: 1, 32>}, {pipeline_mode = #tpu.pipeline_mode<synchronous>, transform_indices = @transform_4, window_bounds = array<i64: 32, 64>}, {pipeline_mode = #tpu.pipeline_mode<synchronous>, transform_indices = @transform_5, window_bounds = array<i64: 1, 64>}, {pipeline_mode = #tpu.pipeline_mode<synchronous>, transform_indices = @transform_6, window_bounds = array<i64: 32, 32>}, {pipeline_mode = #tpu.pipeline_mode<synchronous>, transform_indices = @transform_7, window_bounds = array<i64: 1, 32>}, {transform_indices = @transform_8, window_bounds = array<i64: 1, 8, 32>}]} {
    %c0_i32 = arith.constant 0 : i32
    %0 = arith.cmpi eq, %arg2, %c0_i32 : i32
    %1 = arith.extui %0 : i1 to i32
    %c0_i32_0 = arith.constant 0 : i32
    %2 = arith.cmpi ne, %1, %c0_i32_0 : i32
    scf.if %2 {
      %c0_69 = arith.constant 0 : index
      %c0_70 = arith.constant 0 : index
      %c0_71 = arith.constant 0 : index
      %118 = vector.load %arg3[%c0_69, %c0_70, %c0_71] : memref<1x8x32xf32, #tpu.memory_space<vmem>>, vector<1x8x32xf32>
      %119 = vector.shape_cast %118 : vector<1x8x32xf32> to vector<8x32xf32>
      %c0_72 = arith.constant 0 : index
      %c0_73 = arith.constant 0 : index
      %120 = vector.load %arg5[%c0_72, %c0_73] : memref<32x32xf32, #tpu.memory_space<vmem>>, vector<32x32xf32>
      %cst_74 = arith.constant dense<0.000000e+00> : vector<8x32xf32>
      %121 = tpu.matmul %119, %120, %cst_74 {dimension_numbers = #tpu.dot_dimension_numbers<[1], [0], [0], [1], [0, 0, 1, 1], [], []>} : vector<8x32xf32>, vector<32x32xf32>, vector<8x32xf32> -> vector<8x32xf32>
      %c0_75 = arith.constant 0 : index
      %c0_76 = arith.constant 0 : index
      %122 = vector.load %arg6[%c0_75, %c0_76] : memref<1x32xf32, #tpu.memory_space<vmem>>, vector<1x32xf32>
      %123 = vector.broadcast %122 : vector<1x32xf32> to vector<8x32xf32>
      %124 = arith.addf %121, %123 : vector<8x32xf32>
      %c0_77 = arith.constant 0 : index
      %c0_78 = arith.constant 0 : index
      %125 = vector.load %arg12[%c0_77, %c0_78] : memref<8x32xf32, #tpu.memory_space<vmem>>, vector<8x32xf32>
      tpu.vector_store %arg12[%c0_77, %c0_78], %124 {strides = array<i32>} : memref<8x32xf32, #tpu.memory_space<vmem>>, vector<8x32xf32>,
      %cst_79 = arith.constant 0xFF800000 : f32
      %126 = vector.broadcast %cst_79 : f32 to vector<8x4xf32>
      %c0_80 = arith.constant 0 : index
      %c0_81 = arith.constant 0 : index
      %127 = vector.load %arg13[%c0_80, %c0_81] : memref<8x4xf32, #tpu.memory_space<vmem>>, vector<8x4xf32>
      tpu.vector_store %arg13[%c0_80, %c0_81], %126 {strides = array<i32>} : memref<8x4xf32, #tpu.memory_space<vmem>>, vector<8x4xf32>,
      %cst_82 = arith.constant 0.000000e+00 : f32
      %128 = vector.broadcast %cst_82 : f32 to vector<8x4xf32>
      %c0_83 = arith.constant 0 : index
      %c0_84 = arith.constant 0 : index
      %129 = vector.load %arg14[%c0_83, %c0_84] : memref<8x4xf32, #tpu.memory_space<vmem>>, vector<8x4xf32>
      tpu.vector_store %arg14[%c0_83, %c0_84], %128 {strides = array<i32>} : memref<8x4xf32, #tpu.memory_space<vmem>>, vector<8x4xf32>,
      %cst_85 = arith.constant 0.000000e+00 : f32
      %130 = vector.broadcast %cst_85 : f32 to vector<8x32xf32>
      %c0_86 = arith.constant 0 : index
      %c0_87 = arith.constant 0 : index
      %131 = vector.load %arg15[%c0_86, %c0_87] : memref<8x32xf32, #tpu.memory_space<vmem>>, vector<8x32xf32>
      tpu.vector_store %arg15[%c0_86, %c0_87], %130 {strides = array<i32>} : memref<8x32xf32, #tpu.memory_space<vmem>>, vector<8x32xf32>,
    } else {
    }
    %c0 = arith.constant 0 : index
    %c0_1 = arith.constant 0 : index
    %c0_2 = arith.constant 0 : index
    %3 = vector.load %arg4[%c0, %c0_1, %c0_2] : memref<1x8x32xf32, #tpu.memory_space<vmem>>, vector<1x8x32xf32>
    %4 = vector.shape_cast %3 : vector<1x8x32xf32> to vector<8x32xf32>
    %c0_3 = arith.constant 0 : index
    %c0_4 = arith.constant 0 : index
    %5 = vector.load %arg7[%c0_3, %c0_4] : memref<32x64xf32, #tpu.memory_space<vmem>>, vector<32x64xf32>
    %cst = arith.constant dense<0.000000e+00> : vector<8x64xf32>
    %6 = tpu.matmul %4, %5, %cst {dimension_numbers = #tpu.dot_dimension_numbers<[1], [0], [0], [1], [0, 0, 1, 1], [], []>} : vector<8x32xf32>, vector<32x64xf32>, vector<8x64xf32> -> vector<8x64xf32>
    %c0_5 = arith.constant 0 : index
    %c0_6 = arith.constant 0 : index
    %7 = vector.load %arg8[%c0_5, %c0_6] : memref<1x64xf32, #tpu.memory_space<vmem>>, vector<1x64xf32>
    %8 = vector.broadcast %7 : vector<1x64xf32> to vector<8x64xf32>
    %9 = arith.addf %6, %8 : vector<8x64xf32>
    %c0_7 = arith.constant 0 : index
    %c0_8 = arith.constant 0 : index
    %10 = vector.load %arg12[%c0_7, %c0_8] : memref<8x32xf32, #tpu.memory_space<vmem>>, vector<8x32xf32>
    %11 = vector.extract_strided_slice %9 {offsets = [0, 0], sizes = [8, 8], strides = [1, 1]} : vector<8x64xf32> to vector<8x8xf32>
    %12 = vector.extract_strided_slice %9 {offsets = [0, 32], sizes = [8, 8], strides = [1, 1]} : vector<8x64xf32> to vector<8x8xf32>
    %13 = vector.extract_strided_slice %10 {offsets = [0, 0], sizes = [8, 8], strides = [1, 1]} : vector<8x32xf32> to vector<8x8xf32>
    %cst_9 = arith.constant dense<0.000000e+00> : vector<8x8xf32>
    %14 = tpu.matmul %13, %11, %cst_9 {dimension_numbers = #tpu.dot_dimension_numbers<[1], [1], [0], [0], [0, 0, 1, 0], [], []>} : vector<8x8xf32>, vector<8x8xf32>, vector<8x8xf32> -> vector<8x8xf32>
    %c0_10 = arith.constant 0 : index
    %c0_11 = arith.constant 0 : index
    %15 = vector.load %arg13[%c0_10, %c0_11] : memref<8x4xf32, #tpu.memory_space<vmem>>, vector<8x1xf32>
    %c0_12 = arith.constant 0 : index
    %c0_13 = arith.constant 0 : index
    %16 = vector.load %arg14[%c0_12, %c0_13] : memref<8x4xf32, #tpu.memory_space<vmem>>, vector<8x1xf32>
    %cst_14 = arith.constant dense<0xFF800000> : vector<8xf32>
    %17 = vector.multi_reduction <maximumf>, %14, %cst_14 [1] : vector<8x8xf32> to vector<8xf32>
    %18 = vector.shape_cast %17 : vector<8xf32> to vector<8x1xf32>
    %19 = arith.maximumf %15, %18 : vector<8x1xf32>
    %20 = arith.subf %15, %19 : vector<8x1xf32>
    %21 = math.exp %20 : vector<8x1xf32>
    %22 = vector.broadcast %19 : vector<8x1xf32> to vector<8x8xf32>
    %23 = arith.subf %14, %22 : vector<8x8xf32>
    %24 = math.exp %23 : vector<8x8xf32>
    %25 = arith.mulf %21, %16 : vector<8x1xf32>
    %cst_15 = arith.constant dense<0.000000e+00> : vector<8xf32>
    %26 = vector.multi_reduction <add>, %24, %cst_15 [1] : vector<8x8xf32> to vector<8xf32>
    %27 = vector.shape_cast %26 : vector<8xf32> to vector<8x1xf32>
    %28 = arith.addf %25, %27 : vector<8x1xf32>
    %c0_16 = arith.constant 0 : index
    %c0_17 = arith.constant 0 : index
    %29 = vector.load %arg14[%c0_16, %c0_17] : memref<8x4xf32, #tpu.memory_space<vmem>>, vector<8x1xf32>
    tpu.vector_store %arg14[%c0_16, %c0_17], %28 {strides = array<i32>} : memref<8x4xf32, #tpu.memory_space<vmem>>, vector<8x1xf32>,
    %c0_18 = arith.constant 0 : index
    %c0_19 = arith.constant 0 : index
    %30 = vector.load %arg13[%c0_18, %c0_19] : memref<8x4xf32, #tpu.memory_space<vmem>>, vector<8x1xf32>
    tpu.vector_store %arg13[%c0_18, %c0_19], %19 {strides = array<i32>} : memref<8x4xf32, #tpu.memory_space<vmem>>, vector<8x1xf32>,
    %c0_20 = arith.constant 0 : index
    %c0_21 = arith.constant 0 : index
    %31 = vector.load %arg15[%c0_20, %c0_21] : memref<8x32xf32, #tpu.memory_space<vmem>>, vector<8x8xf32>
    %32 = vector.broadcast %21 : vector<8x1xf32> to vector<8x8xf32>
    %33 = arith.mulf %32, %31 : vector<8x8xf32>
    %cst_22 = arith.constant dense<0.000000e+00> : vector<8x8xf32>
    %34 = tpu.matmul %24, %12, %cst_22 {dimension_numbers = #tpu.dot_dimension_numbers<[1], [0], [0], [1], [0, 0, 1, 1], [], []>} : vector<8x8xf32>, vector<8x8xf32>, vector<8x8xf32> -> vector<8x8xf32>
    %35 = arith.addf %33, %34 : vector<8x8xf32>
    %c0_23 = arith.constant 0 : index
    %c0_24 = arith.constant 0 : index
    %36 = vector.load %arg15[%c0_23, %c0_24] : memref<8x32xf32, #tpu.memory_space<vmem>>, vector<8x8xf32>
    tpu.vector_store %arg15[%c0_23, %c0_24], %35 {strides = array<i32>} : memref<8x32xf32, #tpu.memory_space<vmem>>, vector<8x8xf32>,
    %37 = vector.extract_strided_slice %9 {offsets = [0, 8], sizes = [8, 8], strides = [1, 1]} : vector<8x64xf32> to vector<8x8xf32>
    %38 = vector.extract_strided_slice %9 {offsets = [0, 40], sizes = [8, 8], strides = [1, 1]} : vector<8x64xf32> to vector<8x8xf32>
    %39 = vector.extract_strided_slice %10 {offsets = [0, 8], sizes = [8, 8], strides = [1, 1]} : vector<8x32xf32> to vector<8x8xf32>
    %cst_25 = arith.constant dense<0.000000e+00> : vector<8x8xf32>
    %40 = tpu.matmul %39, %37, %cst_25 {dimension_numbers = #tpu.dot_dimension_numbers<[1], [1], [0], [0], [0, 0, 1, 0], [], []>} : vector<8x8xf32>, vector<8x8xf32>, vector<8x8xf32> -> vector<8x8xf32>
    %c0_26 = arith.constant 0 : index
    %c1 = arith.constant 1 : index
    %41 = vector.load %arg13[%c0_26, %c1] : memref<8x4xf32, #tpu.memory_space<vmem>>, vector<8x1xf32>
    %c0_27 = arith.constant 0 : index
    %c1_28 = arith.constant 1 : index
    %42 = vector.load %arg14[%c0_27, %c1_28] : memref<8x4xf32, #tpu.memory_space<vmem>>, vector<8x1xf32>
    %cst_29 = arith.constant dense<0xFF800000> : vector<8xf32>
    %43 = vector.multi_reduction <maximumf>, %40, %cst_29 [1] : vector<8x8xf32> to vector<8xf32>
    %44 = vector.shape_cast %43 : vector<8xf32> to vector<8x1xf32>
    %45 = arith.maximumf %41, %44 : vector<8x1xf32>
    %46 = arith.subf %41, %45 : vector<8x1xf32>
    %47 = math.exp %46 : vector<8x1xf32>
    %48 = vector.broadcast %45 : vector<8x1xf32> to vector<8x8xf32>
    %49 = arith.subf %40, %48 : vector<8x8xf32>
    %50 = math.exp %49 : vector<8x8xf32>
    %51 = arith.mulf %47, %42 : vector<8x1xf32>
    %cst_30 = arith.constant dense<0.000000e+00> : vector<8xf32>
    %52 = vector.multi_reduction <add>, %50, %cst_30 [1] : vector<8x8xf32> to vector<8xf32>
    %53 = vector.shape_cast %52 : vector<8xf32> to vector<8x1xf32>
    %54 = arith.addf %51, %53 : vector<8x1xf32>
    %c0_31 = arith.constant 0 : index
    %c1_32 = arith.constant 1 : index
    %55 = vector.load %arg14[%c0_31, %c1_32] : memref<8x4xf32, #tpu.memory_space<vmem>>, vector<8x1xf32>
    tpu.vector_store %arg14[%c0_31, %c1_32], %54 {strides = array<i32>} : memref<8x4xf32, #tpu.memory_space<vmem>>, vector<8x1xf32>,
    %c0_33 = arith.constant 0 : index
    %c1_34 = arith.constant 1 : index
    %56 = vector.load %arg13[%c0_33, %c1_34] : memref<8x4xf32, #tpu.memory_space<vmem>>, vector<8x1xf32>
    tpu.vector_store %arg13[%c0_33, %c1_34], %45 {strides = array<i32>} : memref<8x4xf32, #tpu.memory_space<vmem>>, vector<8x1xf32>,
    %c0_35 = arith.constant 0 : index
    %c8 = arith.constant 8 : index
    %57 = vector.load %arg15[%c0_35, %c8] : memref<8x32xf32, #tpu.memory_space<vmem>>, vector<8x8xf32>
    %58 = vector.broadcast %47 : vector<8x1xf32> to vector<8x8xf32>
    %59 = arith.mulf %58, %57 : vector<8x8xf32>
    %cst_36 = arith.constant dense<0.000000e+00> : vector<8x8xf32>
    %60 = tpu.matmul %50, %38, %cst_36 {dimension_numbers = #tpu.dot_dimension_numbers<[1], [0], [0], [1], [0, 0, 1, 1], [], []>} : vector<8x8xf32>, vector<8x8xf32>, vector<8x8xf32> -> vector<8x8xf32>
    %61 = arith.addf %59, %60 : vector<8x8xf32>
    %c0_37 = arith.constant 0 : index
    %c8_38 = arith.constant 8 : index
    %62 = vector.load %arg15[%c0_37, %c8_38] : memref<8x32xf32, #tpu.memory_space<vmem>>, vector<8x8xf32>
    tpu.vector_store %arg15[%c0_37, %c8_38], %61 {strides = array<i32>} : memref<8x32xf32, #tpu.memory_space<vmem>>, vector<8x8xf32>,
    %63 = vector.extract_strided_slice %9 {offsets = [0, 16], sizes = [8, 8], strides = [1, 1]} : vector<8x64xf32> to vector<8x8xf32>
    %64 = vector.extract_strided_slice %9 {offsets = [0, 48], sizes = [8, 8], strides = [1, 1]} : vector<8x64xf32> to vector<8x8xf32>
    %65 = vector.extract_strided_slice %10 {offsets = [0, 16], sizes = [8, 8], strides = [1, 1]} : vector<8x32xf32> to vector<8x8xf32>
    %cst_39 = arith.constant dense<0.000000e+00> : vector<8x8xf32>
    %66 = tpu.matmul %65, %63, %cst_39 {dimension_numbers = #tpu.dot_dimension_numbers<[1], [1], [0], [0], [0, 0, 1, 0], [], []>} : vector<8x8xf32>, vector<8x8xf32>, vector<8x8xf32> -> vector<8x8xf32>
    %c0_40 = arith.constant 0 : index
    %c2 = arith.constant 2 : index
    %67 = vector.load %arg13[%c0_40, %c2] : memref<8x4xf32, #tpu.memory_space<vmem>>, vector<8x1xf32>
    %c0_41 = arith.constant 0 : index
    %c2_42 = arith.constant 2 : index
    %68 = vector.load %arg14[%c0_41, %c2_42] : memref<8x4xf32, #tpu.memory_space<vmem>>, vector<8x1xf32>
    %cst_43 = arith.constant dense<0xFF800000> : vector<8xf32>
    %69 = vector.multi_reduction <maximumf>, %66, %cst_43 [1] : vector<8x8xf32> to vector<8xf32>
    %70 = vector.shape_cast %69 : vector<8xf32> to vector<8x1xf32>
    %71 = arith.maximumf %67, %70 : vector<8x1xf32>
    %72 = arith.subf %67, %71 : vector<8x1xf32>
    %73 = math.exp %72 : vector<8x1xf32>
    %74 = vector.broadcast %71 : vector<8x1xf32> to vector<8x8xf32>
    %75 = arith.subf %66, %74 : vector<8x8xf32>
    %76 = math.exp %75 : vector<8x8xf32>
    %77 = arith.mulf %73, %68 : vector<8x1xf32>
    %cst_44 = arith.constant dense<0.000000e+00> : vector<8xf32>
    %78 = vector.multi_reduction <add>, %76, %cst_44 [1] : vector<8x8xf32> to vector<8xf32>
    %79 = vector.shape_cast %78 : vector<8xf32> to vector<8x1xf32>
    %80 = arith.addf %77, %79 : vector<8x1xf32>
    %c0_45 = arith.constant 0 : index
    %c2_46 = arith.constant 2 : index
    %81 = vector.load %arg14[%c0_45, %c2_46] : memref<8x4xf32, #tpu.memory_space<vmem>>, vector<8x1xf32>
    tpu.vector_store %arg14[%c0_45, %c2_46], %80 {strides = array<i32>} : memref<8x4xf32, #tpu.memory_space<vmem>>, vector<8x1xf32>,
    %c0_47 = arith.constant 0 : index
    %c2_48 = arith.constant 2 : index
    %82 = vector.load %arg13[%c0_47, %c2_48] : memref<8x4xf32, #tpu.memory_space<vmem>>, vector<8x1xf32>
    tpu.vector_store %arg13[%c0_47, %c2_48], %71 {strides = array<i32>} : memref<8x4xf32, #tpu.memory_space<vmem>>, vector<8x1xf32>,
    %c0_49 = arith.constant 0 : index
    %c16 = arith.constant 16 : index
    %83 = vector.load %arg15[%c0_49, %c16] : memref<8x32xf32, #tpu.memory_space<vmem>>, vector<8x8xf32>
    %84 = vector.broadcast %73 : vector<8x1xf32> to vector<8x8xf32>
    %85 = arith.mulf %84, %83 : vector<8x8xf32>
    %cst_50 = arith.constant dense<0.000000e+00> : vector<8x8xf32>
    %86 = tpu.matmul %76, %64, %cst_50 {dimension_numbers = #tpu.dot_dimension_numbers<[1], [0], [0], [1], [0, 0, 1, 1], [], []>} : vector<8x8xf32>, vector<8x8xf32>, vector<8x8xf32> -> vector<8x8xf32>
    %87 = arith.addf %85, %86 : vector<8x8xf32>
    %c0_51 = arith.constant 0 : index
    %c16_52 = arith.constant 16 : index
    %88 = vector.load %arg15[%c0_51, %c16_52] : memref<8x32xf32, #tpu.memory_space<vmem>>, vector<8x8xf32>
    tpu.vector_store %arg15[%c0_51, %c16_52], %87 {strides = array<i32>} : memref<8x32xf32, #tpu.memory_space<vmem>>, vector<8x8xf32>,
    %89 = vector.extract_strided_slice %9 {offsets = [0, 24], sizes = [8, 8], strides = [1, 1]} : vector<8x64xf32> to vector<8x8xf32>
    %90 = vector.extract_strided_slice %9 {offsets = [0, 56], sizes = [8, 8], strides = [1, 1]} : vector<8x64xf32> to vector<8x8xf32>
    %91 = vector.extract_strided_slice %10 {offsets = [0, 24], sizes = [8, 8], strides = [1, 1]} : vector<8x32xf32> to vector<8x8xf32>
    %cst_53 = arith.constant dense<0.000000e+00> : vector<8x8xf32>
    %92 = tpu.matmul %91, %89, %cst_53 {dimension_numbers = #tpu.dot_dimension_numbers<[1], [1], [0], [0], [0, 0, 1, 0], [], []>} : vector<8x8xf32>, vector<8x8xf32>, vector<8x8xf32> -> vector<8x8xf32>
    %c0_54 = arith.constant 0 : index
    %c3 = arith.constant 3 : index
    %93 = vector.load %arg13[%c0_54, %c3] : memref<8x4xf32, #tpu.memory_space<vmem>>, vector<8x1xf32>
    %c0_55 = arith.constant 0 : index
    %c3_56 = arith.constant 3 : index
    %94 = vector.load %arg14[%c0_55, %c3_56] : memref<8x4xf32, #tpu.memory_space<vmem>>, vector<8x1xf32>
    %cst_57 = arith.constant dense<0xFF800000> : vector<8xf32>
    %95 = vector.multi_reduction <maximumf>, %92, %cst_57 [1] : vector<8x8xf32> to vector<8xf32>
    %96 = vector.shape_cast %95 : vector<8xf32> to vector<8x1xf32>
    %97 = arith.maximumf %93, %96 : vector<8x1xf32>
    %98 = arith.subf %93, %97 : vector<8x1xf32>
    %99 = math.exp %98 : vector<8x1xf32>
    %100 = vector.broadcast %97 : vector<8x1xf32> to vector<8x8xf32>
    %101 = arith.subf %92, %100 : vector<8x8xf32>
    %102 = math.exp %101 : vector<8x8xf32>
    %103 = arith.mulf %99, %94 : vector<8x1xf32>
    %cst_58 = arith.constant dense<0.000000e+00> : vector<8xf32>
    %104 = vector.multi_reduction <add>, %102, %cst_58 [1] : vector<8x8xf32> to vector<8xf32>
    %105 = vector.shape_cast %104 : vector<8xf32> to vector<8x1xf32>
    %106 = arith.addf %103, %105 : vector<8x1xf32>
    %c0_59 = arith.constant 0 : index
    %c3_60 = arith.constant 3 : index
    %107 = vector.load %arg14[%c0_59, %c3_60] : memref<8x4xf32, #tpu.memory_space<vmem>>, vector<8x1xf32>
    tpu.vector_store %arg14[%c0_59, %c3_60], %106 {strides = array<i32>} : memref<8x4xf32, #tpu.memory_space<vmem>>, vector<8x1xf32>,
    %c0_61 = arith.constant 0 : index
    %c3_62 = arith.constant 3 : index
    %108 = vector.load %arg13[%c0_61, %c3_62] : memref<8x4xf32, #tpu.memory_space<vmem>>, vector<8x1xf32>
    tpu.vector_store %arg13[%c0_61, %c3_62], %97 {strides = array<i32>} : memref<8x4xf32, #tpu.memory_space<vmem>>, vector<8x1xf32>,
    %c0_63 = arith.constant 0 : index
    %c24 = arith.constant 24 : index
    %109 = vector.load %arg15[%c0_63, %c24] : memref<8x32xf32, #tpu.memory_space<vmem>>, vector<8x8xf32>
    %110 = vector.broadcast %99 : vector<8x1xf32> to vector<8x8xf32>
    %111 = arith.mulf %110, %109 : vector<8x8xf32>
    %cst_64 = arith.constant dense<0.000000e+00> : vector<8x8xf32>
    %112 = tpu.matmul %102, %90, %cst_64 {dimension_numbers = #tpu.dot_dimension_numbers<[1], [0], [0], [1], [0, 0, 1, 1], [], []>} : vector<8x8xf32>, vector<8x8xf32>, vector<8x8xf32> -> vector<8x8xf32>
    %113 = arith.addf %111, %112 : vector<8x8xf32>
    %c0_65 = arith.constant 0 : index
    %c24_66 = arith.constant 24 : index
    %114 = vector.load %arg15[%c0_65, %c24_66] : memref<8x32xf32, #tpu.memory_space<vmem>>, vector<8x8xf32>
    tpu.vector_store %arg15[%c0_65, %c24_66], %113 {strides = array<i32>} : memref<8x32xf32, #tpu.memory_space<vmem>>, vector<8x8xf32>,
    %c0_i32_67 = arith.constant 0 : i32
    %115 = arith.cmpi eq, %arg2, %c0_i32_67 : i32
    %116 = arith.extui %115 : i1 to i32
    %c0_i32_68 = arith.constant 0 : i32
    %117 = arith.cmpi ne, %116, %c0_i32_68 : i32
    scf.if %117 {
      %c0_69 = arith.constant 0 : index
      %c0_70 = arith.constant 0 : index
      %118 = vector.load %arg14[%c0_69, %c0_70] : memref<8x4xf32, #tpu.memory_space<vmem>>, vector<8x1xf32>
      %119 = tpu.reciprocal %118 {approx = true} : vector<8x1xf32> -> vector<8x1xf32>
      %c0_71 = arith.constant 0 : index
      %c0_72 = arith.constant 0 : index
      %120 = vector.load %arg15[%c0_71, %c0_72] : memref<8x32xf32, #tpu.memory_space<vmem>>, vector<8x8xf32>
      %121 = vector.broadcast %119 : vector<8x1xf32> to vector<8x8xf32>
      %122 = arith.mulf %120, %121 : vector<8x8xf32>
      %c0_73 = arith.constant 0 : index
      %c0_74 = arith.constant 0 : index
      %123 = vector.load %arg15[%c0_73, %c0_74] : memref<8x32xf32, #tpu.memory_space<vmem>>, vector<8x8xf32>
      tpu.vector_store %arg15[%c0_73, %c0_74], %122 {strides = array<i32>} : memref<8x32xf32, #tpu.memory_space<vmem>>, vector<8x8xf32>,
      %c0_75 = arith.constant 0 : index
      %c1_76 = arith.constant 1 : index
      %124 = vector.load %arg14[%c0_75, %c1_76] : memref<8x4xf32, #tpu.memory_space<vmem>>, vector<8x1xf32>
      %125 = tpu.reciprocal %124 {approx = true} : vector<8x1xf32> -> vector<8x1xf32>
      %c0_77 = arith.constant 0 : index
      %c8_78 = arith.constant 8 : index
      %126 = vector.load %arg15[%c0_77, %c8_78] : memref<8x32xf32, #tpu.memory_space<vmem>>, vector<8x8xf32>
      %127 = vector.broadcast %125 : vector<8x1xf32> to vector<8x8xf32>
      %128 = arith.mulf %126, %127 : vector<8x8xf32>
      %c0_79 = arith.constant 0 : index
      %c8_80 = arith.constant 8 : index
      %129 = vector.load %arg15[%c0_79, %c8_80] : memref<8x32xf32, #tpu.memory_space<vmem>>, vector<8x8xf32>
      tpu.vector_store %arg15[%c0_79, %c8_80], %128 {strides = array<i32>} : memref<8x32xf32, #tpu.memory_space<vmem>>, vector<8x8xf32>,
      %c0_81 = arith.constant 0 : index
      %c2_82 = arith.constant 2 : index
      %130 = vector.load %arg14[%c0_81, %c2_82] : memref<8x4xf32, #tpu.memory_space<vmem>>, vector<8x1xf32>
      %131 = tpu.reciprocal %130 {approx = true} : vector<8x1xf32> -> vector<8x1xf32>
      %c0_83 = arith.constant 0 : index
      %c16_84 = arith.constant 16 : index
      %132 = vector.load %arg15[%c0_83, %c16_84] : memref<8x32xf32, #tpu.memory_space<vmem>>, vector<8x8xf32>
      %133 = vector.broadcast %131 : vector<8x1xf32> to vector<8x8xf32>
      %134 = arith.mulf %132, %133 : vector<8x8xf32>
      %c0_85 = arith.constant 0 : index
      %c16_86 = arith.constant 16 : index
      %135 = vector.load %arg15[%c0_85, %c16_86] : memref<8x32xf32, #tpu.memory_space<vmem>>, vector<8x8xf32>
      tpu.vector_store %arg15[%c0_85, %c16_86], %134 {strides = array<i32>} : memref<8x32xf32, #tpu.memory_space<vmem>>, vector<8x8xf32>,
      %c0_87 = arith.constant 0 : index
      %c3_88 = arith.constant 3 : index
      %136 = vector.load %arg14[%c0_87, %c3_88] : memref<8x4xf32, #tpu.memory_space<vmem>>, vector<8x1xf32>
      %137 = tpu.reciprocal %136 {approx = true} : vector<8x1xf32> -> vector<8x1xf32>
      %c0_89 = arith.constant 0 : index
      %c24_90 = arith.constant 24 : index
      %138 = vector.load %arg15[%c0_89, %c24_90] : memref<8x32xf32, #tpu.memory_space<vmem>>, vector<8x8xf32>
      %139 = vector.broadcast %137 : vector<8x1xf32> to vector<8x8xf32>
      %140 = arith.mulf %138, %139 : vector<8x8xf32>
      %c0_91 = arith.constant 0 : index
      %c24_92 = arith.constant 24 : index
      %141 = vector.load %arg15[%c0_91, %c24_92] : memref<8x32xf32, #tpu.memory_space<vmem>>, vector<8x8xf32>
      tpu.vector_store %arg15[%c0_91, %c24_92], %140 {strides = array<i32>} : memref<8x32xf32, #tpu.memory_space<vmem>>, vector<8x8xf32>,
      %c0_93 = arith.constant 0 : index
      %c0_94 = arith.constant 0 : index
      %142 = vector.load %arg15[%c0_93, %c0_94] : memref<8x32xf32, #tpu.memory_space<vmem>>, vector<8x32xf32>
      %c0_95 = arith.constant 0 : index
      %c0_96 = arith.constant 0 : index
      %143 = vector.load %arg9[%c0_95, %c0_96] : memref<32x32xf32, #tpu.memory_space<vmem>>, vector<32x32xf32>
      %cst_97 = arith.constant dense<0.000000e+00> : vector<8x32xf32>
      %144 = tpu.matmul %142, %143, %cst_97 {dimension_numbers = #tpu.dot_dimension_numbers<[1], [0], [0], [1], [0, 0, 1, 1], [], []>} : vector<8x32xf32>, vector<32x32xf32>, vector<8x32xf32> -> vector<8x32xf32>
      %c0_98 = arith.constant 0 : index
      %c0_99 = arith.constant 0 : index
      %145 = vector.load %arg10[%c0_98, %c0_99] : memref<1x32xf32, #tpu.memory_space<vmem>>, vector<1x32xf32>
      %146 = vector.broadcast %145 : vector<1x32xf32> to vector<8x32xf32>
      %147 = arith.addf %144, %146 : vector<8x32xf32>
      %c0_100 = arith.constant 0 : index
      %c0_101 = arith.constant 0 : index
      %c0_102 = arith.constant 0 : index
      %148 = vector.load %arg11[%c0_100, %c0_101, %c0_102] : memref<1x8x32xf32, #tpu.memory_space<vmem>>, vector<1x8x32xf32>
      %149 = vector.shape_cast %148 : vector<1x8x32xf32> to vector<8x32xf32>
      %150 = vector.shape_cast %147 : vector<8x32xf32> to vector<1x8x32xf32>
      tpu.vector_store %arg11[%c0_100, %c0_101, %c0_102], %150 {strides = array<i32>} : memref<1x8x32xf32, #tpu.memory_space<vmem>>, vector<1x8x32xf32>,
    } else {
    }
    return
  }
  func.func @transform_0(%arg0: i32, %arg1: i32, %arg2: i32) -> (i32, i32, i32) {
    %c0_i32 = arith.constant 0 : i32
    %c0_i32_0 = arith.constant 0 : i32
    return %arg0, %arg1, %c0_i32 : i32, i32, i32
  }
  func.func @transform_1(%arg0: i32, %arg1: i32, %arg2: i32) -> (i32, i32, i32) {
    %c0_i32 = arith.constant 0 : i32
    %c0_i32_0 = arith.constant 0 : i32
    return %arg0, %arg2, %c0_i32 : i32, i32, i32
  }
  func.func @transform_2(%arg0: i32, %arg1: i32, %arg2: i32) -> (i32, i32) {
    %c0_i32 = arith.constant 0 : i32
    %c0_i32_0 = arith.constant 0 : i32
    %c0_i32_1 = arith.constant 0 : i32
    return %c0_i32, %c0_i32_0 : i32, i32
  }
  func.func @transform_3(%arg0: i32, %arg1: i32, %arg2: i32) -> (i32, i32) {
    %c0_i32 = arith.constant 0 : i32
    %c0_i32_0 = arith.constant 0 : i32
    %c0_i32_1 = arith.constant 0 : i32
    return %c0_i32, %c0_i32_0 : i32, i32
  }
  func.func @transform_4(%arg0: i32, %arg1: i32, %arg2: i32) -> (i32, i32) {
    %c0_i32 = arith.constant 0 : i32
    %c0_i32_0 = arith.constant 0 : i32
    %c0_i32_1 = arith.constant 0 : i32
    return %c0_i32, %c0_i32_0 : i32, i32
  }
  func.func @transform_5(%arg0: i32, %arg1: i32, %arg2: i32) -> (i32, i32) {
    %c0_i32 = arith.constant 0 : i32
    %c0_i32_0 = arith.constant 0 : i32
    %c0_i32_1 = arith.constant 0 : i32
    return %c0_i32, %c0_i32_0 : i32, i32
  }
  func.func @transform_6(%arg0: i32, %arg1: i32, %arg2: i32) -> (i32, i32) {
    %c0_i32 = arith.constant 0 : i32
    %c0_i32_0 = arith.constant 0 : i32
    %c0_i32_1 = arith.constant 0 : i32
    return %c0_i32, %c0_i32_0 : i32, i32
  }
  func.func @transform_7(%arg0: i32, %arg1: i32, %arg2: i32) -> (i32, i32) {
    %c0_i32 = arith.constant 0 : i32
    %c0_i32_0 = arith.constant 0 : i32
    %c0_i32_1 = arith.constant 0 : i32
    return %c0_i32, %c0_i32_0 : i32, i32
  }
  func.func @transform_8(%arg0: i32, %arg1: i32, %arg2: i32) -> (i32, i32, i32) {
    %c0_i32 = arith.constant 0 : i32
    %c0_i32_0 = arith.constant 0 : i32
    return %arg0, %arg1, %c0_i32 : i32, i32, i32
  }
}

</mosaic_0001>

<bundles_post_ra>
// kernel: tpu_custom_call.1
= control target key start
LH: loop header
LB: loop body
LE: loop exit
PB: predicated region body
PF: predicated region fallthrough
CT: control target
= control target key end

     0   :  { %s1875_s0 = inlined_call_operand.hbm [shape: f32[2,8,32], index: 0, kind: input, shape index: {}]   ;;  %s1876_s1 = inlined_call_operand.hbm [shape: f32[2,8,32], index: 1, kind: input, shape index: {}]   ;;  %s1877_s2 = inlined_call_operand.hbm [shape: f32[32,32], index: 2, kind: input, shape index: {}]   ;;  %s1878_s3 = inlined_call_operand.vmem [shape: f32[1,32], index: 3, kind: input, shape index: {}]   ;;  %s1879_s4 = inlined_call_operand.hbm [shape: f32[32,64], index: 4, kind: input, shape index: {}]   ;;  %s1880_s5 = inlined_call_operand.vmem [shape: f32[1,64], index: 5, kind: input, shape index: {}]   ;;  %s1881_s6 = inlined_call_operand.hbm [shape: f32[32,32], index: 6, kind: input, shape index: {}]   ;;  %s1882_s7 = inlined_call_operand.vmem [shape: f32[1,32], index: 7, kind: input, shape index: {}]   ;;  %s1883_s8 = inlined_call_operand.hbm [shape: f32[2,8,32], index: 8, kind: output, shape index: {}]  }
   0x1   :  { %1889 = sst [smem:[#allocation27_spill]] %s1877_s2 }
   0x2   :  { %1890 = sst [smem:[#allocation28_spill]] %s1879_s4 }
   0x3   :  { %1891 = sst [smem:[#allocation29_spill]] %s1881_s6 }
   0x4   :  { %13 = vsyncpa [#allocation7], 0 }
   0x5   :  { %15 = vsyncpa [#allocation7 + $0x1], 0 }
   0x6   :  { %16 = vsyncpa [#allocation10], 0 }
   0x7   :  { %18 = vsyncpa [#allocation10 + $0x1], 0 }
   0x8   :  { %19 = vsyncpa [#allocation13], 0 }
   0x9   :  { %20 = vsyncpa [#allocation8], 0 }
   0xa   :  { %22 = vsyncpa [#allocation8 + $0x1], 0  ;;  %s1607_s27 = smov 0   ;;  %s1609_s28 = smov 0  }
   0xb   :  { %s1611_s29 = smov 0   ;;  %s1613_s30 = smov 0  }
   0xc   :  { %s1615_s9 = smov 0   ;;  %s1617_s10 = smov 0  }
   0xd LB: > { %1892 = sst [smem:[#allocation21_spill]] %s1519_s27  ;;  %s1638_s11 = sadd.s32 4294967295, %s1539_s10   ;;  %s1539_s10 = sphi %s1617_s10, %s28_s10   ;;  %s1535_s9 = sphi %s1615_s9, %s1912_s9   ;;  %s1531_s30 = sphi %s1613_s30, %s1911_s30   ;;  %s1527_s29 = sphi %s1611_s29, %s1910_s29   ;;  %s1523_s28 = sphi %s1609_s28, %s1914_s28   ;;  %s1519_s27 = sphi %s1607_s27, %s1913_s27  }
   0xe   : > { %1893 = sst [smem:[#allocation22_spill]] %s1527_s29  ;;  %p1110_p0 = scmp.ge.s32.totalorder %s1539_s10, 1 }
   0xf   : > { %1894 = sst [smem:[#allocation23_spill]] %s1535_s9  ;;  %p70_p1 = scmp.eq.s32.totalorder %s1638_s11, 0 }
  0x10   : > { %p262_p2 = scmp.lt.s32.totalorder %s1539_s10, 3  ;;  %s1895_s2 = sld [smem:[#allocation27_spill]] }
  0x11   : > { %s1541_s16 = smov [#allocation11]   ;;  %p1114_p6 = scmp.ge.s32.totalorder %s1539_s10, 2 }
  0x12   : > { %p1646_p3 = pnand %p1110_p0, %p262_p2  ;;  %s275_s17 = sshll.u32 %s1541_s16, 4  ;;  %s276_s17 = int_to_ptr.vmem [resolvable:$true] %s275_s17 }
  0x13   : > { %s1898_s4 = sld [smem:[#allocation28_spill]]  ;;  %s1542_s22 = smov 128  }
  0x14   : > { %p1163_p4 = pneg %p1646_p3  ;;  %s1543_s23 = smov 8  }
  0x15   : > { %s1544_s24 = smov [#allocation12]   ;;  %s1899_s6 = sld [smem:[#allocation29_spill]] }
  0x16   : > { %s273_s14 = sshll.u32 %s1895_s2, 4  ;;  %p1654_p5 = pnand %p1163_p4, %p70_p1  ;;  %s274_s14 = int_to_ptr.hbm [resolvable:$true] %s273_s14 }
  0x17   : > { %s292_s25 = sshll.u32 %s1544_s24, 4  ;;  %s1545_s16 = smov [#allocation14]   ;;  %s293_s25 = int_to_ptr.vmem [resolvable:$true] %s292_s25 }
  0x18   : > { %1166 = dma.hbm_to_vmem [thread:$0]  (!%p1654_p5), %s274_s14, 512, %s276_s17, [#allocation10], %s1542_s22, %s1542_s22, %s1543_s23  }
  0x19   : > { %s290_s21 = sshll.u32 %s1898_s4, 4  ;;  %s309_s19 = sshll.u32 %s1545_s16, 4  ;;  %s291_s21 = int_to_ptr.hbm [resolvable:$true] %s290_s21  ;;  %s310_s19 = int_to_ptr.vmem [resolvable:$true] %s309_s19 }
  0x1a   : > { %1169 = dma.hbm_to_vmem [thread:$0]  (!%p1654_p5), %s291_s21, 512, %s293_s25, [#allocation13], %s1542_s22, %s1542_s22, %s1543_s23  }
  0x1b   : > { %s307_s13 = sshll.u32 %s1899_s6, 4  ;;  %s1109_s14 = sadd.s32 4294967294, %s1539_s10   ;;  %s308_s13 = int_to_ptr.hbm [resolvable:$true] %s307_s13 }
  0x1c   : > { %1172 = dma.hbm_to_vmem [thread:$0]  (!%p1654_p5), %s308_s13, 512, %s310_s19, [#allocation13], %s1542_s22, %s1542_s22, %s1543_s23  }
  0x1d   : > { %s47_s17 = sadd.s32 1, %s1535_s9  ;;  %s56_s20 = sadd.s32 1, %s1527_s29 }
  0x1e   : > { %p49_p7 = scmp.ge.s32.totalorder %s47_s17, 2  ;;  %p63_p8 = scmp.ne.s32.totalorder %s1527_s29, %s1523_s28 }
  0x1f   : > { %p64_p9 = scmp.eq.s32.totalorder %s1539_s10, 0  ;;  %p69_p10 = scmp.ne.s32.totalorder %s1523_s28, %s1519_s27 }
  0x20   : > { %s1916_s17 = smov (%p49_p7, %s47_s17), 0  ;;  %p249_p13 = scmp.eq.s32.totalorder %s1638_s11, 1 }
  0x21   : > { %1900 = sst [smem:[#allocation24_spill]] %s1916_s17  ;;  %p1681_p11 = por %p64_p9, %p63_p8 }
  0x22   : > { %p1687_p12 = por %p70_p1, %p69_p10  ;;  %s51_s22 = ssub.s32 %s1535_s9, %s1916_s17 }
  0x23   : > { %p54_p0 = scmp.eq.s32.totalorder %s51_s22, 0  ;;  %p255_p2 = scmp.eq.s32.totalorder %s1109_s14, 1 }
  0x24   : > { %p1694_p4 = por %p249_p13, %p63_p8  ;;  %p1187_p5 = scmp.lt.s32.totalorder %s1539_s10, 2 }
  0x25   : > { %s1700_s24 = scalar_select %p54_p0, %s1527_s29, %s56_s20  }
  0x26   : > { %p1702_p7 = por %p255_p2, %p69_p10  ;;  %s326_s26 = sand.u32 1, %s1527_s29  }
  0x27   : > { %1904 = sst [smem:[#allocation25_spill]] %s1700_s24  ;;  %s1115_s12 = sshll.u32 %s326_s26, 3 }
  0x28   : > { %s1905_s25 = scalar_select %p1702_p7, 1, 0 }
  0x29   : > { %s1116_s13 = sshll.u32 %s1535_s9, 3  ;;  %s330_s14 = scalar_lea.vmem [#allocation6], %s1115_s12 }
  0x2a   : > { %1906 = sst [smem:[#allocation26_spill]] %s1905_s25  ;;  %s335_s22 = scalar_lea.hbm %s1875_s0, %s1116_s13 }
  0x2b   : > { %s339_s2 = sshll.u32 %s330_s14, 4  ;;  %s337_s4 = sshll.u32 %s335_s22, 4  ;;  %s340_s2 = int_to_ptr.vmem [resolvable:$true] %s339_s2  ;;  %s338_s4 = int_to_ptr.hbm [resolvable:$true] %s337_s4 }
  0x2c   : > { %p1174_p8 = pnand %p1187_p5, %p1681_p11  ;;  %s355_s17 = scalar_lea.hbm %s1876_s1, %s1116_s13 }
  0x2d   : > { %s346_s24 = sand.u32 1, %s1539_s10   ;;  %s327_s25 = scalar_lea.sflag [#allocation7], %s326_s26 }
  0x2e   : > { %1176 = dma.hbm_to_vmem [thread:$0]  (!%p1174_p8), %s338_s4, 128, %s340_s2, %s327_s25  }
  0x2f   : > { %s357_s29 = sshll.u32 %s355_s17, 4  ;;  %s350_s9 = scalar_lea.vmem [#allocation9], %s1115_s12  ;;  %s358_s29 = int_to_ptr.hbm [resolvable:$true] %s357_s29 }
  0x30   : > { %s359_s27 = sshll.u32 %s350_s9, 4  ;;  %s347_s16 = scalar_lea.sflag [#allocation10], %s346_s24  ;;  %s360_s27 = int_to_ptr.vmem [resolvable:$true] %s359_s27 }
  0x31   : > { %1179 = dma.hbm_to_vmem [thread:$0]  (!%p1174_p8), %s358_s29, 128, %s360_s27, %s347_s16  }
  0x32   : > { %368 = sbr.rel (%p1646_p3) target bundleno = 1409 (0x581), region = 52  ;;  %s1720_s21 = sand.u32 (!%p1646_p3), 1, %s1523_s28  }
  0x33   : > { %s1723_s6 = sshll.u32 (!%p1646_p3), %s1720_s21, 3  ;;  %s371_s2 = scalar_lea.sflag (!%p1646_p3), [#allocation7], %s1720_s21 }
  0x34   : > { %s374_s4 = scalar_lea.vmem (!%p1646_p3), [#allocation6], %s1723_s6 }
  0x37   : > { %1498 = dma.done.wait (%p1687_p12), %s371_s2, 128  }
  0x38   : > { %1500 = vsyncadd (%p1687_p12), %s371_s2, 4294967168  ;;  %s380_s27 = sand.u32 1, %s1638_s11   ;;  %s384_s9 = scalar_lea.vmem [#allocation9], %s1723_s6 }
  0x39   : > { %s381_s29 = scalar_lea.sflag [#allocation10], %s380_s27 }
  0x3a   : > { %1502 = dma.done.wait (%p1687_p12), %s381_s29, 128  }
  0x3b   : > { %1504 = vsyncadd (%p1687_p12), %s381_s29, 4294967168 }
  0x3c   : > { %1506 = dma.done.wait (%p70_p1), [#allocation10], 512  }
  0x3d   : > { %1508 = vsyncadd (%p70_p1), [#allocation10], 4294966784 }
  0x3e   : > { %1510 = dma.done.wait (%p70_p1), [#allocation13], 1024  }
  0x3f   : > { %1512 = vsyncadd (%p70_p1), [#allocation13], 4294966272  ;;  %v446_v0 = vld [vmem:[#allocation11 + $0x18] sm:$0xff]  ;;  %v445_v2 = vld [vmem:[#allocation11 + $0x10] sm:$0xff]  ;;  %vm451_vm0 = vcmask 261120   ;;  %vm514_vm1 = vcmask 64512  }
  0x40   : > { %v484_v1 = vld [vmem:[#allocation12 + $0x18] sm:$0xff]  ;;  %467 = vmatpush.msra.mxu0 %v446_v0  ;;  %v483_v3 = vld [vmem:[#allocation12 + $0x10] sm:$0xff]  ;;  %v444_v4 = vld [vmem:[#allocation11 + $0x8] sm:$0xff]  ;;  %s1546_s24 = smov 96   ;;  %s1547_s25 = smov 120   ;;  %vm476_vm2 = vcmask 31744  }
  0x41   : > { %505 = vmatpush.msra.mxu1 %v484_v1  ;;  %v482_v5 = vld [vmem:[#allocation12 + $0x8] sm:$0xff]  ;;  %v443_v6 = vld [vmem:[#allocation11] sm:$0xff]  ;;  %v480_v9 = vld [vmem:[%s384_s9] sm:$0xff]  ;;  %s1548_s26 = smov 112   ;;  %s1549_s12 = smov 104   ;;  %v1550_v24 = vmov -inf  }
  0x42   : > { %468 = vmatpush.msra.mxu0 %v445_v2  ;;  %v481_v7 = vld [vmem:[#allocation12] sm:$0xff]  ;;  %477 = vst.msk [vmem:[#allocation3] sm:$0xff] %vm476_vm2, %v1550_v24  ;;  %v1551_v25 = vmov 0   ;;  %v1552_v26 = vmov 0.0   ;;  %vm563_vm3 = vcmask 7168   ;;  %s1553_s13 = smov 88  }
  0x43   : > { %506 = vmatpush.msra.mxu1 %v483_v3  ;;  %v442_v8 = vld [vmem:[%s374_s4] sm:$0xff]  ;;  %1261 = vset.pattern.permute.xlu0 %v1551_v25  ;;  %478 = vst.msk [vmem:[#allocation4] sm:$0xff] %vm476_vm2, %v1552_v26  ;;  %s1554_s19 = smov 72   ;;  %v1555_v47 = vmov 1   ;;  %v1556_v48 = vmov 3   ;;  %vm651_vm4 = vcmask 15368  }
  0x44   : > { %469 = vmatpush.msra.mxu0 %v444_v4  ;;  %v1274_v10 = vld [vmem:[%s1878_s3] ss:$0 sm:$0xff]  ;;  %1265 = vset.pattern.permute.xlu1 %v1551_v25  ;;  %479 = vst.msk [vmem:[#allocation5] sm:$0xff] %vm451_vm0, %v1552_v26  ;;  %vm744_vm5 = vcmask 23568   ;;  %v1557_v55 = vmov 2   ;;  %vm837_vm6 = vcmask 31768  }
  0x45   : > { %507 = vmatpush.msra.mxu1 %v482_v5  ;;  %v1275_v11 = vld [vmem:[%s1880_s5] ss:$0 sm:$0xff]  ;;  %1262 = vset.pattern.permute.xlu2 %v1555_v47  ;;  %s1558_s22 = smov 80   ;;  %s1559_s14 = smov 8   ;;  %vm692_vm7 = vcmask 130112   ;;  %vm785_vm8 = vcmask 195712  }
  0x46   : > { %470 = vmatpush.msra.mxu0 %v443_v6  ;;  %s1560_s20 = smov 16   ;;  %s1561_s16 = smov 24   ;;  %vm878_vm9 = vcmask 261312  }
  0x47   : > { %508 = vmatpush.msra.mxu1 %v481_v7  ;;  %1126 = vmatmul.msk.f32.vlgmr.msra.gmra.mxu0 %vm451_vm0, %v442_v8  ;;  %s1142_s2 = sshll.u32 %s1531_s30, 3  ;;  %s437_s15 = scalar_lea.vmem [#allocation15], %s1723_s6 }
  0x48   : > { %1127 = vmatmul.msk.f32.vlgmr.msra.gmra.mxu1 %vm451_vm0, %v480_v9  ;;  %s968_s29 = scalar_lea.hbm %s1883_s8, %s1142_s2  ;;  %s970_s17 = sshll.u32 %s437_s15, 4  ;;  %s971_s17 = int_to_ptr.vmem [resolvable:$true] %s970_s17 }
  0x49   : > { %v1770_v27 = vld [vmem:[#allocation3] sm:$0xff]  ;;  %s972_s18 = sshll.u32 %s968_s29, 4  ;;  %s1465_s6 = scalar_lea.hbm %s1883_s8, 16  ;;  %s973_s18 = int_to_ptr.hbm [resolvable:$true] %s972_s18 }
  0x4a   : > { %s1459_s30 = sshra.s32 %s973_s18, 4  ;;  %s1460_s30 = int_to_ptr.hbm [resolvable:$true] %s1459_s30 }
  0x4b   : > { %p1466_p10 = scmp.lt.s32.totalorder %s1460_s30, %s1883_s8 }
  0xc4   : > { %v472_v12 = vpop.f32.mrf.mxu0 }
  0xc5   : > { %v510_v13 = vpop.f32.mrf.mxu1  ;;  %v473_v14 = vadd.f32 %v1274_v10, %v472_v12 }
  0xc6   : > { %v1753_v15 = vadd.f32 %v1275_v11, %v510_v13 }
  0xc7   : > { %475 = vst.msk [vmem:[#allocation2] sm:$0xff] %vm451_vm0, %v473_v14 }
  0xc8   : > { %573 = vrot.lane.b32.xlu1 %v1753_v15, %s1546_s24  ;;  %1128 = vmatpush.xpose.msk.msra.mxu2 %vm514_vm1, %v1753_v15  ;;  %s957_s24 = scalar_lea.sflag [#allocation8], %s1720_s21 }
  0xce   : > { %v513_v16 = vld [vmem:[#allocation2] sm:$0xff] }
  0xcf   : > { %601 = vrot.lane.b32.xlu2 %v513_v16, %s1547_s25  ;;  %1129 = vmatmul.msk.f32.vlgmr.msra.gmra.mxu2 %vm514_vm1, %v513_v16 }
  0xd0   : > { %603 = vrot.lane.b32.xlu1 %v1753_v15, %s1547_s25  ;;  %s1461_s25 = scalar_lea.hbm %s1460_s30, 8 }
  0xd1   : > { %p1462_p1 = scmp.ne.s32.totalorder %s1460_s30, %s1461_s25  ;;  %p1467_p11 = scmp.lt.s32.totalorder %s1465_s6, %s1461_s25 }
  0xd3   : > { %p1463_p3 = pnand %p1462_p1, %p1694_p4  ;;  %p1468_p12 = por %p1467_p11, %p1466_p10 }
  0xd5   : > { %p1464_p9 = pneg %p1463_p3 }
  0xd7   : > { %696 = vrot.lane.b32.xlu2 %v1753_v15, %s1548_s26  ;;  %p1469_p13 = pnand %p1468_p12, %p1464_p9 }
  0xd8   : > { %694 = vrot.lane.b32.xlu1 %v513_v16, %s1548_s26 }
  0xdf   : > { %789 = vrot.lane.b32.xlu2 %v1753_v15, %s1549_s12 }
  0xe0   : > { %787 = vrot.lane.b32.xlu1 %v513_v16, %s1549_s12 }
 0x129   : > { %v602_v17 = vpop.permute.xlu2 %601 }
 0x131   : > { %v697_v18 = vpop.permute.xlu2 %696 }
 0x132   : > { %1134 = vmatpush.xpose.msk.msrb.mxu0 %vm514_vm1, %v697_v18 }
 0x139   : > { %v790_v38 = vpop.permute.xlu2 %789 }
 0x13a   : > { %v574_v19 = vpop.permute.xlu1 %573 }
 0x13b   : > { %594 = vmatpush.msra.mxu3 %v574_v19 }
 0x142   : > { %v604_v20 = vpop.permute.xlu1 %603 }
 0x143   : > { %1131 = vmatpush.xpose.msk.msrb.mxu3 %vm514_vm1, %v604_v20 }
 0x14a   : > { %v695_v21 = vpop.permute.xlu1 %694 }
 0x14b   : > { %1135 = vmatmul.msk.f32.vlgmr.msrb.gmra.mxu0 %vm514_vm1, %v695_v21 }
 0x152   : > { %v538_v22 = vpop.f32.mrf.mxu2  ;;  %v788_v36 = vpop.permute.xlu1 %787 }
 0x153   : > { %v543_v23 = vsel %vm514_vm1, %v538_v22, -inf }
 0x154   : > { %544 = vmax.xlane.f32.xlu0 %v543_v23 }
 0x1c7   : > { %v545_v29 = vpop.xlane.xlu0 %544 }
 0x1c8   : > { %v1772_v28 = vpop.f32.mrf.mxu0  ;;  %v1777_v31 = vmax.f32 %v1770_v27, %v545_v29 }
 0x1c9   : > { %v724_v30 = vsel %vm514_vm1, %v1772_v28, -inf }
 0x1ca   : > { %725 = vmax.xlane.f32.xlu1 %v724_v30  ;;  %v547_v32 = vsub.f32 %v1770_v27, %v1777_v31  ;;  %565 = vst.msk [vmem:[#allocation3] sm:$0xff] %vm563_vm3, %v1777_v31  ;;  %552 = vperm.xlu0 %1261, %v1777_v31  }
 0x1cc   : > { %v548_v11 = vmul.f32 1.442695, %v547_v32 }
 0x1d1   : > { %v629_v50 = vld [vmem:[#allocation3] sm:$0xff] }
 0x1d2   : > { %1264 = vset.pattern.permute.xlu0 %v1556_v48 }
 0x1e3   : > { %661 = vrot.lane.b32.xlu1 %v1753_v15, %s1553_s13 }
 0x1eb   : > { %847 = vrot.lane.b32.xlu1 %v1753_v15, %s1554_s19 }
 0x23c   : > { %v553_v33 = vpop.permute.xlu0 %552 }
 0x23d   : > { %v555_v34 = vsub.f32 %v538_v22, %v553_v33  ;;  %v726_v39 = vpop.xlane.xlu1 %725  ;;  %v542_v22 = vld [vmem:[#allocation4] sm:$0xff] }
 0x23f   : > { %v556_v35 = vmul.f32 1.442695, %v555_v34 }
 0x241   : > { %1277 = vpow2.f32 %v556_v35 }
 0x247   : > { %v1278_v37 = vpop.eup %1277 }
 0x248   : > { %1130 = vmatmul.msk.f32.vlgmr.msra.gmra.mxu3 %vm514_vm1, %v1278_v37  ;;  %v559_v61 = vsel %vm514_vm1, %v1278_v37, 0.0 }
 0x249   : > { %1137 = vmatpush.xpose.msk.msra.mxu3 %vm514_vm1, %v790_v38 }
 0x250   : > { %1132 = vmatmul.msk.f32.vlgmr.msrb.gmra.mxu3 %vm514_vm1, %v602_v17 }
 0x255   : > { %v662_v40 = vpop.permute.xlu1 %661 }
 0x256   : > { %682 = vmatpush.msrb.mxu2 %v662_v40 }
 0x258   : > { %1138 = vmatmul.msk.f32.vlgmr.msra.gmra.mxu3 %vm514_vm1, %v788_v36  ;;  %v566_v36 = vld [vmem:[#allocation5] sm:$0xff] }
 0x25d   : > { %v848_v41 = vpop.permute.xlu1 %847 }
 0x25e   : > { %868 = vmatpush.msra.mxu2 %v848_v41 }
 0x2cb   : > { %v1790_v42 = vpop.f32.mrf.mxu3 }
 0x2d3   : > { %v626_v43 = vpop.f32.mrf.mxu3 }
 0x2d4   : > { %v631_v44 = vsel %vm514_vm1, %v626_v43, -inf }
 0x2d5   : > { %632 = vmax.xlane.f32.xlu2 %v631_v44 }
 0x2db   : > { %v1793_v45 = vpop.f32.mrf.mxu3 }
 0x2dc   : > { %v817_v46 = vsel %vm514_vm1, %v1793_v45, -inf }
 0x2dd   : > { %818 = vmax.xlane.f32.xlu0 %v817_v46 }
 0x348   : > { %v633_v49 = vpop.xlane.xlu2 %632 }
 0x349   : > { %v634_v51 = vmax.f32 %v629_v50, %v633_v49 }
 0x34b   : > { %v635_v52 = vsub.f32 %v629_v50, %v634_v51  ;;  %653 = vst.msk [vmem:[#allocation3] sm:$0xff] %vm651_vm4, %v634_v51  ;;  %640 = vperm.xlu2 %1262, %v634_v51  }
 0x34d   : > { %v636_v62 = vmul.f32 1.442695, %v635_v52 }
 0x34f   : > { %1279 = vpow2.f32 %v636_v62 }
 0x350   : > { %v819_v57 = vpop.xlane.xlu0 %818 }
 0x352   : > { %v722_v53 = vld [vmem:[#allocation3] sm:$0xff] }
 0x353   : > { %v727_v54 = vmax.f32 %v722_v53, %v726_v39  ;;  %1263 = vset.pattern.permute.xlu2 %v1557_v55 }
 0x355   : > { %746 = vst.msk [vmem:[#allocation3] sm:$0xff] %vm744_vm5, %v727_v54  ;;  %733 = vperm.xlu2 %1263, %v727_v54   ;;  %v728_v56 = vsub.f32 %v722_v53, %v727_v54  ;;  %v1280_v63 = vpop.eup %1279 }
 0x357   : > { %v729_v12 = vmul.f32 1.442695, %v728_v56 }
 0x35c   : > { %v815_v58 = vld [vmem:[#allocation3] sm:$0xff] }
 0x35d   : > { %v820_v59 = vmax.f32 %v815_v58, %v819_v57  ;;  %754 = vrot.lane.b32.xlu2 %v1753_v15, %s1558_s22 }
 0x35e   : > { %1266 = vset.pattern.permute.xlu2 %v1555_v47 }
 0x35f   : > { %v821_v60 = vsub.f32 %v815_v58, %v820_v59  ;;  %839 = vst.msk [vmem:[#allocation3] sm:$0xff] %vm837_vm6, %v820_v59  ;;  %826 = vperm.xlu0 %1264, %v820_v59  }
 0x361   : > { %v822_v14 = vmul.f32 1.442695, %v821_v60 }
 0x367   : > { %1270 = vset.pattern.permute.xlu0 %v1555_v47 }
 0x386   : > { %560 = vadd.xlane.f32.xlu2 %v559_v61 }
 0x39e   : > { %657 = vperm.xlu2 %1266, %v1280_v63  }
 0x3a5   : > { %v641_v0 = vpop.permute.xlu2 %640 }
 0x3a6   : > { %v643_v1 = vsub.f32 %v626_v43, %v641_v0  ;;  %1271 = vset.pattern.permute.xlu2 %v1557_v55 }
 0x3a8   : > { %v644_v2 = vmul.f32 1.442695, %v643_v1  ;;  %v927_v1 = vld [vmem:[#allocation14 + $0x18] sm:$0xff] }
 0x3a9   : > { %947 = vmatpush.msra.mxu0 %v927_v1 }
 0x3aa   : > { %1281 = vpow2.f32 %v644_v2  ;;  %v926_v2 = vld [vmem:[#allocation14 + $0x10] sm:$0xff] }
 0x3ab   : > { %948 = vmatpush.msra.mxu0 %v926_v2 }
 0x3af   : > { %v734_v3 = vpop.permute.xlu2 %733 }
 0x3b0   : > { %v1282_v4 = vpop.eup %1281  ;;  %v736_v5 = vsub.f32 %v1772_v28, %v734_v3  ;;  %v925_v3 = vld [vmem:[#allocation14 + $0x8] sm:$0xff] }
 0x3b1   : > { %1133 = vmatmul.msk.f32.vlgmr.msrb.gmra.mxu2 %vm514_vm1, %v1282_v4  ;;  %v647_v6 = vsel %vm514_vm1, %v1282_v4, 0.0  ;;  %v924_v4 = vld [vmem:[#allocation14] sm:$0xff]  ;;  %949 = vmatpush.msra.mxu0 %v925_v3 }
 0x3b2   : > { %v737_v7 = vmul.f32 1.442695, %v736_v5  ;;  %648 = vadd.xlane.f32.xlu1 %v647_v6 }
 0x3b3   : > { %950 = vmatpush.msra.mxu0 %v924_v4 }
 0x3b4   : > { %1283 = vpow2.f32 %v737_v7 }
 0x3b5   : > { %1285 = vpow2.f32 %v548_v11 }
 0x3b6   : > { %1287 = vpow2.f32 %v729_v12 }
 0x3b7   : > { %v755_v8 = vpop.permute.xlu2 %754  ;;  %1289 = vpow2.f32 %v822_v14 }
 0x3b8   : > { %775 = vmatpush.msrb.mxu1 %v755_v8 }
 0x3ba   : > { %v1284_v9 = vpop.eup %1283 }
 0x3bb   : > { %1136 = vmatmul.msk.f32.vlgmr.msrb.gmra.mxu1 %vm514_vm1, %v1284_v9  ;;  %v740_v10 = vsel %vm514_vm1, %v1284_v9, 0.0  ;;  %v1286_v13 = vpop.eup %1285 }
 0x3bc   : > { %741 = vadd.xlane.f32.xlu0 %v740_v10  ;;  %v1288_v17 = vpop.eup %1287  ;;  %v558_v23 = vmul.f32 %v1286_v13, %v542_v22 }
 0x3bd   : > { %v1290_v19 = vpop.eup %1289 }
 0x3cb   : > { %569 = vperm.xlu1 %1265, %v1286_v13  }
 0x3d1   : > { %v827_v15 = vpop.permute.xlu0 %826 }
 0x3d2   : > { %v829_v16 = vsub.f32 %v1793_v45, %v827_v15  ;;  %v1276_v15 = vld [vmem:[%s1882_s7] ss:$0 sm:$0xff] }
 0x3d3   : > { %1267 = vset.pattern.permute.xlu1 %v1557_v55 }
 0x3d4   : > { %v830_v18 = vmul.f32 1.442695, %v829_v16  ;;  %750 = vperm.xlu1 %1267, %v1288_v17  }
 0x3d6   : > { %1291 = vpow2.f32 %v830_v18 }
 0x3dc   : > { %v1292_v20 = vpop.eup %1291  ;;  %1268 = vset.pattern.permute.xlu1 %v1556_v48 }
 0x3dd   : > { %1139 = vmatmul.msk.f32.vlgmr.msra.gmra.mxu2 %vm514_vm1, %v1292_v20  ;;  %843 = vperm.xlu1 %1268, %v1290_v19   ;;  %v833_v21 = vsel %vm514_vm1, %v1292_v20, 0.0 }
 0x3de   : > { %834 = vadd.xlane.f32.xlu2 %v833_v21 }
 0x3e5   : > { %1269 = vset.pattern.permute.xlu1 %v1551_v25 }
 0x3f9   : > { %v561_v24 = vpop.xlane.xlu2 %560 }
 0x3fa   : > { %v562_v26 = vadd.f32 %v561_v24, %v558_v23 }
 0x3fc   : > { %564 = vst.msk [vmem:[#allocation4] sm:$0xff] %vm563_vm3, %v562_v26 }
 0x401   : > { %v658_v40 = vpop.permute.xlu2 %657 }
 0x403   : > { %v630_v27 = vld [vmem:[#allocation4] sm:$0xff] }
 0x404   : > { %v646_v28 = vmul.f32 %v1280_v63, %v630_v27 }
 0x425   : > { %v649_v29 = vpop.xlane.xlu1 %648 }
 0x426   : > { %v650_v30 = vadd.f32 %v649_v29, %v646_v28 }
 0x428   : > { %652 = vst.msk [vmem:[#allocation4] sm:$0xff] %vm651_vm4, %v650_v30 }
 0x42f   : > { %v723_v31 = vld [vmem:[#allocation4] sm:$0xff]  ;;  %v742_v33 = vpop.xlane.xlu0 %741 }
 0x430   : > { %v739_v32 = vmul.f32 %v1288_v17, %v723_v31 }
 0x432   : > { %v743_v34 = vadd.f32 %v742_v33, %v739_v32 }
 0x434   : > { %745 = vst.msk [vmem:[#allocation4] sm:$0xff] %vm744_vm5, %v743_v34  ;;  %v684_v35 = vpop.f32.mrf.mxu2 }
 0x435   : > { %688 = vrot.lane.b32.xlu0 %v684_v35, %s1559_s14 }
 0x438   : > { %v777_v25 = vpop.f32.mrf.mxu1 }
 0x439   : > { %781 = vrot.lane.b32.xlu2 %v777_v25, %s1560_s20 }
 0x43b   : > { %v816_v41 = vld [vmem:[#allocation4] sm:$0xff] }
 0x43c   : > { %v832_v43 = vmul.f32 %v1290_v19, %v816_v41 }
 0x43d   : > { %v570_v37 = vpop.permute.xlu1 %569 }
 0x43e   : > { %v572_v38 = vmul.f32 %v570_v37, %v566_v36 }
 0x440   : > { %v599_v39 = vadd.f32 %v1790_v42, %v572_v38 }
 0x442   : > { %600 = vst.msk [vmem:[#allocation5] sm:$0xff] %vm514_vm1, %v599_v39 }
 0x446   : > { %v751_v53 = vpop.permute.xlu1 %750 }
 0x449   : > { %v654_v42 = vld [vmem:[#allocation5] sm:$0xff] }
 0x44a   : > { %v660_v50 = vmul.f32 %v658_v40, %v654_v42 }
 0x44f   : > { %v844_v58 = vpop.permute.xlu1 %843 }
 0x451   : > { %v835_v44 = vpop.xlane.xlu2 %834 }
 0x452   : > { %v836_v45 = vadd.f32 %v835_v44, %v832_v43 }
 0x454   : > { %838 = vst.msk [vmem:[#allocation4] sm:$0xff] %vm837_vm6, %v836_v45 }
 0x45b   : > { %v893_v46 = vld [vmem:[#allocation4] sm:$0xff] }
 0x45c   : > { %1293 = vrcp.f32 %v893_v46 }
 0x460   : > { %v870_v47 = vpop.f32.mrf.mxu2 }
 0x461   : > { %874 = vrot.lane.b32.xlu2 %v870_v47, %s1561_s16 }
 0x462   : > { %v1294_v49 = vpop.eup %1293 }
 0x463   : > { %898 = vperm.xlu0 %1270, %v1294_v49   ;;  %888 = vperm.xlu1 %1269, %v1294_v49  }
 0x469   : > { %908 = vperm.xlu2 %1271, %v1294_v49  }
 0x46b   : > { %1272 = vset.pattern.permute.xlu1 %v1556_v48  ;;  %1273 = vset.pattern.permute.xlu0 %v1556_v48 }
 0x46c   : > { %918 = vperm.xlu1 %1272, %v1294_v49  }
 0x493   : > { %v782_v56 = vpop.permute.xlu2 %781 }
 0x4a7   : > { %v689_v51 = vpop.permute.xlu0 %688 }
 0x4a8   : > { %v691_v52 = vadd.f32 %v689_v51, %v660_v50 }
 0x4aa   : > { %693 = vst.msk [vmem:[#allocation5] sm:$0xff] %vm692_vm7, %v691_v52 }
 0x4b1   : > { %v747_v54 = vld [vmem:[#allocation5] sm:$0xff] }
 0x4b2   : > { %v753_v55 = vmul.f32 %v751_v53, %v747_v54 }
 0x4b4   : > { %v784_v57 = vadd.f32 %v782_v56, %v753_v55 }
 0x4b6   : > { %786 = vst.msk [vmem:[#allocation5] sm:$0xff] %vm785_vm8, %v784_v57 }
 0x4bb   : > { %v875_v48 = vpop.permute.xlu2 %874 }
 0x4bd   : > { %v840_v59 = vld [vmem:[#allocation5] sm:$0xff] }
 0x4be   : > { %v846_v60 = vmul.f32 %v844_v58, %v840_v59 }
 0x4c0   : > { %v877_v61 = vadd.f32 %v875_v48, %v846_v60 }
 0x4c2   : > { %879 = vst.msk [vmem:[#allocation5] sm:$0xff] %vm878_vm9, %v877_v61 }
 0x4c3   : > { %v909_v8 = vpop.permute.xlu2 %908 }
 0x4c9   : > { %v885_v62 = vld [vmem:[#allocation5] sm:$0xff] }
 0x4d5   : > { %v889_v63 = vpop.permute.xlu1 %888  ;;  %v899_v5 = vpop.permute.xlu0 %898 }
 0x4d6   : > { %v891_v0 = vmul.f32 %v889_v63, %v885_v62 }
 0x4d8   : > { %892 = vst.msk [vmem:[#allocation5] sm:$0xff] %vm514_vm1, %v891_v0 }
 0x4de   : > { %v919_v12 = vpop.permute.xlu1 %918 }
 0x4df   : > { %v895_v6 = vld [vmem:[#allocation5] sm:$0xff] }
 0x4e0   : > { %v901_v7 = vmul.f32 %v899_v5, %v895_v6 }
 0x4e2   : > { %902 = vst.msk [vmem:[#allocation5] sm:$0xff] %vm692_vm7, %v901_v7 }
 0x4e9   : > { %v905_v9 = vld [vmem:[#allocation5] sm:$0xff] }
 0x4ea   : > { %v911_v10 = vmul.f32 %v909_v8, %v905_v9 }
 0x4ec   : > { %912 = vst.msk [vmem:[#allocation5] sm:$0xff] %vm785_vm8, %v911_v10 }
 0x4f3   : > { %v915_v11 = vld [vmem:[#allocation5] sm:$0xff] }
 0x4f4   : > { %v921_v13 = vmul.f32 %v919_v12, %v915_v11 }
 0x4f6   : > { %922 = vst.msk [vmem:[#allocation5] sm:$0xff] %vm878_vm9, %v921_v13 }
 0x4fd   : > { %v923_v14 = vld [vmem:[#allocation5] sm:$0xff] }
 0x4fe   : > { %1140 = vmatmul.msk.f32.vlgmr.msra.gmra.mxu0 %vm451_vm0, %v923_v14 }
 0x57b   : > { %v952_v16 = vpop.f32.mrf.mxu0 }
 0x57c   : > { %v953_v17 = vadd.f32 %v1276_v15, %v952_v16 }
 0x57e   : > { %955 = vst.msk [vmem:[%s437_s15] sm:$0xff] %vm451_vm0, %v953_v17 }
 0x57f   : > { %1472 = shalt.err (!%p1469_p13)
}
 0x580   : > { %1161 = dma.vmem_to_hbm [thread:$0]  (%p1694_p4), %s971_s17, 128, %s973_s18, %s957_s24  }
 0x581 PF: > { %s1907_s21 = sld [smem:[#allocation21_spill]]  ;;  %p1181_p0 = pnand %p1114_p6, %p1702_p7 }
 0x583   : > { %p1182_p2 = pneg %p1181_p0 }
 0x587   : > { %s984_s14 = sand.u32 1, %s1907_s21  }
 0x588   : > { %s985_s20 = scalar_lea.sflag [#allocation8], %s984_s14 }
 0x589   : > { %1514 = dma.done.wait (%p1182_p2), %s985_s20, 128  }
 0x58a   : > { %1516 = vsyncadd (%p1182_p2), %s985_s20, 4294967168  ;;  %s28_s10 = sadd.s32 1, %s1539_s10   ;;  %s1909_s16 = sld [smem:[#allocation22_spill]] }
 0x58b   : > { %p25_p5 = scmp.ge.s32.totalorder %s28_s10, 4   ;;  %s1910_s29 = sld [smem:[#allocation25_spill]] }
 0x58c   : > { %s1911_s30 = sld [smem:[#allocation23_spill]]  ;;  %s1913_s27 = smov %s1523_s28 }
 0x58d   : > { %s1912_s9 = sld [smem:[#allocation24_spill]]  ;;  %27 = sbr.rel (!%p25_p5) target bundleno = 13 (0xd), region = 130 }
 0x590   : > { %s1914_s28 = smov %s1909_s16 }
 0x592   :  { %991 = vsyncpa [#allocation7], 1 }
 0x593   :  { %993 = vsyncpa [#allocation7 + $0x1], 1 }
 0x594   :  { %994 = vsyncpa [#allocation10], 1 }
 0x595   :  { %996 = vsyncpa [#allocation10 + $0x1], 1 }
 0x596   :  { %997 = vsyncpa [#allocation13], 1 }
 0x597   :  { %998 = vsyncpa [#allocation8], 1 }
 0x598   :  { %1000 = vsyncpa [#allocation8 + $0x1], 1 }

</bundles_post_ra>
